<compile_context>
chip_gen: v5e
topology: v5e:2x2
jax: 0.10.0
libtpu: 0.0.40
codegen_flags: <defaults>
</compile_context>

<pallas_src>
import functools

import jax
import jax.numpy as jnp
from jax.experimental import pallas as pl
from jax.experimental.pallas import tpu as pltpu

BN_EPS = 1e-5
VMEM_SPEC = pl.BlockSpec(memory_space=pltpu.MemorySpace.VMEM)


# ------------------------------- fused kernel ------------------------------- #

def _value_head_kernel(x_ref, wc_ref, g_ref, beta_ref, w1_ref, b1_ref,
                       w2_ref, b2_ref, o_ref, *, batch):
    """x_ref: (9*B, Cin) pixels-by-channels, rows ordered (h, w, b)."""
    # 1x1 conv as a matmul.  Conv bias omitted: it is cancelled exactly by the
    # batch-statistics BatchNorm that follows (mean includes the bias).
    y = jnp.dot(x_ref[...], wc_ref[...], preferred_element_type=jnp.float32)   # (9B, 32)

    # BatchNorm2d (train mode): per-channel stats over all N*H*W rows, biased var.
    mean = jnp.mean(y, axis=0, keepdims=True)
    var = jnp.mean((y - mean) ** 2, axis=0, keepdims=True)
    y = (y - mean) * jax.lax.rsqrt(var + BN_EPS)
    y = jnp.maximum(y * g_ref[...] + beta_ref[...], 0.0)                        # (9B, 32)

    # Flatten + Linear1 (+ReLU) without any reshape/transpose: rows are (h, w, b)
    # ordered, so spatial position s is the contiguous row block [s*B, (s+1)*B).
    # h1[b] = sum_s y[sB + b, :] @ w1[s]  — 9 accumulating MXU dots into one fp32 tile.
    h = jnp.dot(y[0:batch, :], w1_ref[0], preferred_element_type=jnp.float32)   # (B, 256)
    for s in range(1, 9):
        h = h + jnp.dot(y[s * batch:(s + 1) * batch, :], w1_ref[s],
                        preferred_element_type=jnp.float32)
    h = jnp.maximum(h + b1_ref[...], 0.0)                                       # (B, 256)

    # Linear2 + tanh (only lane-sparse store in the whole head).
    v = jnp.dot(h, w2_ref[...], preferred_element_type=jnp.float32) + b2_ref[...]
    o_ref[...] = jnp.tanh(v)                                                    # (B, 1)


# --------------------------------- wrapper ---------------------------------- #

def value_head_forward(params, x_nchw):
    """x_nchw: (B, Cin, 3, 3) float32 (same layout as the torch module). -> (B, 1)."""
    B, C, H, W = x_nchw.shape
    assert (H, W) == (3, 3), "ValueHead assumes 3x3 feature maps"
    # NCHW -> (H, W, B, C) -> (9*B, C): rows ordered (h, w, b) so each spatial
    # position is a contiguous B-row block inside the kernel.
    x2d = jnp.transpose(x_nchw, (2, 3, 0, 1)).reshape(H * W * B, C)
    return pl.pallas_call(
        functools.partial(_value_head_kernel, batch=B),
        out_shape=jax.ShapeDtypeStruct((B, 1), jnp.float32),
        in_specs=[VMEM_SPEC] * 8,
        out_specs=VMEM_SPEC,
    )(x2d,
      params["wc"],
      params["gamma"].reshape(1, -1),
      params["beta"].reshape(1, -1),
      params["w1"],
      params["b1"].reshape(1, -1),
      params["w2"],
      params["b2"].reshape(1, 1))


# -------------------------- pure-JAX reference ------------------------------ #

def value_head_reference(params, x_nchw):
    B, C, H, W = x_nchw.shape
    x = jnp.transpose(x_nchw, (0, 2, 3, 1)).reshape(B * H * W, C)     # (B*9, C)
    y = jnp.dot(x, params["wc"], precision="highest")                  # conv bias cancels in BN
    mean = jnp.mean(y, axis=0, keepdims=True)
    var = jnp.mean((y - mean) ** 2, axis=0, keepdims=True)
    y = (y - mean) * jax.lax.rsqrt(var + BN_EPS)
    y = jnp.maximum(y * params["gamma"] + params["beta"], 0.0)
    y = y.reshape(B, H * W, 32)
    h = jnp.einsum("bsc,sco->bo", y, params["w1"], precision="highest") + params["b1"]
    h = jnp.maximum(h, 0.0)
    return jnp.tanh(jnp.dot(h, params["w2"], precision="highest") + params["b2"])


# ----------------------------- deterministic params ------------------------- #

def init_params(key, in_channel):
    ks = jax.random.split(key, 7)
    return dict(
        wc=0.05 * jax.random.normal(ks[0], (in_channel, 32), jnp.float32),      # 1x1 conv weight
        gamma=1.0 + 0.1 * jax.random.normal(ks[1], (32,), jnp.float32),
        beta=0.1 * jax.random.normal(ks[2], (32,), jnp.float32),
        # linear1 weight pre-permuted to (spatial=9, cin=32, out=256); see header comment
        # for the mapping from the torch (256, 288) layout.
        w1=0.05 * jax.random.normal(ks[3], (9, 32, 256), jnp.float32),
        b1=0.05 * jax.random.normal(ks[4], (256,), jnp.float32),
        w2=0.05 * jax.random.normal(ks[5], (256, 1), jnp.float32),
        b2=0.05 * jax.random.normal(ks[6], (1,), jnp.float32),
    )


# ------------------------------------ main ---------------------------------- #

if __name__ == "__main__":
    key = jax.random.PRNGKey(0)
    pkey, xkey = jax.random.split(key)

    B, IN_CH = 2, 256                         # ValueHead input in the AlphaZero net: (B, 256, 3, 3)
    params = init_params(pkey, IN_CH)
    X = jax.random.normal(xkey, (B, IN_CH, 3, 3), jnp.float32)

    fwd = jax.jit(value_head_forward)
    out = fwd(params, X)
    jax.block_until_ready(out)

    ref = value_head_reference(params, X)

    assert out.shape == (B, 1) and out.dtype == jnp.float32
    assert bool(jnp.all(jnp.abs(out) <= 1.0))
    assert bool(jnp.allclose(out, ref, atol=2e-3, rtol=2e-3)), "mismatch vs pure-JAX reference"
    print("KERNEL_OK")
</pallas_src>

<mosaic_0001>
module attributes {stable_mosaic.version = 11 : i64} {
  func.func @_value_head_kernel(%arg0: memref<18x256xf32, #tpu.memory_space<vmem>>, %arg1: memref<256x32xf32, #tpu.memory_space<vmem>>, %arg2: memref<1x32xf32, #tpu.memory_space<vmem>>, %arg3: memref<1x32xf32, #tpu.memory_space<vmem>>, %arg4: memref<9x32x256xf32, #tpu.memory_space<vmem>>, %arg5: memref<1x256xf32, #tpu.memory_space<vmem>>, %arg6: memref<256x1xf32, #tpu.memory_space<vmem>>, %arg7: memref<1x1xf32, #tpu.memory_space<vmem>>, %arg8: memref<2x1xf32, #tpu.memory_space<vmem>>) attributes {dimension_semantics = [], scalar_prefetch = 0 : i64, scratch_operands = 0 : i64, tpu.core_type = #tpu.core_type<tc>} {
    %c0 = arith.constant 0 : index
    %c0_0 = arith.constant 0 : index
    %0 = vector.load %arg0[%c0, %c0_0] : memref<18x256xf32, #tpu.memory_space<vmem>>, vector<18x256xf32>
    %c0_1 = arith.constant 0 : index
    %c0_2 = arith.constant 0 : index
    %1 = vector.load %arg1[%c0_1, %c0_2] : memref<256x32xf32, #tpu.memory_space<vmem>>, vector<256x32xf32>
    %cst = arith.constant dense<0.000000e+00> : vector<18x32xf32>
    %2 = tpu.matmul %0, %1, %cst {dimension_numbers = #tpu.dot_dimension_numbers<[1], [0], [0], [1], [0, 0, 1, 1], [], []>} : vector<18x256xf32>, vector<256x32xf32>, vector<18x32xf32> -> vector<18x32xf32>
    %cst_3 = arith.constant dense<0.000000e+00> : vector<32xf32>
    %3 = vector.multi_reduction <add>, %2, %cst_3 [0] : vector<18x32xf32> to vector<32xf32>
    %4 = vector.shape_cast %3 : vector<32xf32> to vector<1x32xf32>
    %cst_4 = arith.constant 1.800000e+01 : f32
    %5 = vector.broadcast %cst_4 : f32 to vector<1x32xf32>
    %6 = arith.divf %4, %5 : vector<1x32xf32>
    %7 = vector.broadcast %6 : vector<1x32xf32> to vector<18x32xf32>
    %8 = arith.subf %2, %7 : vector<18x32xf32>
    %9 = arith.mulf %8, %8 : vector<18x32xf32>
    %cst_5 = arith.constant dense<0.000000e+00> : vector<32xf32>
    %10 = vector.multi_reduction <add>, %9, %cst_5 [0] : vector<18x32xf32> to vector<32xf32>
    %11 = vector.shape_cast %10 : vector<32xf32> to vector<1x32xf32>
    %cst_6 = arith.constant 1.800000e+01 : f32
    %12 = vector.broadcast %cst_6 : f32 to vector<1x32xf32>
    %13 = arith.divf %11, %12 : vector<1x32xf32>
    %14 = vector.broadcast %6 : vector<1x32xf32> to vector<18x32xf32>
    %15 = arith.subf %2, %14 : vector<18x32xf32>
    %cst_7 = arith.constant 9.99999974E-6 : f32
    %16 = vector.broadcast %cst_7 : f32 to vector<1x32xf32>
    %17 = arith.addf %13, %16 : vector<1x32xf32>
    %18 = math.rsqrt %17 : vector<1x32xf32>
    %19 = vector.broadcast %18 : vector<1x32xf32> to vector<18x32xf32>
    %20 = arith.mulf %15, %19 : vector<18x32xf32>
    %c0_8 = arith.constant 0 : index
    %c0_9 = arith.constant 0 : index
    %21 = vector.load %arg2[%c0_8, %c0_9] : memref<1x32xf32, #tpu.memory_space<vmem>>, vector<1x32xf32>
    %22 = vector.broadcast %21 : vector<1x32xf32> to vector<18x32xf32>
    %23 = arith.mulf %20, %22 : vector<18x32xf32>
    %c0_10 = arith.constant 0 : index
    %c0_11 = arith.constant 0 : index
    %24 = vector.load %arg3[%c0_10, %c0_11] : memref<1x32xf32, #tpu.memory_space<vmem>>, vector<1x32xf32>
    %25 = vector.broadcast %24 : vector<1x32xf32> to vector<18x32xf32>
    %26 = arith.addf %23, %25 : vector<18x32xf32>
    %cst_12 = arith.constant 0.000000e+00 : f32
    %27 = vector.broadcast %cst_12 : f32 to vector<18x32xf32>
    %28 = arith.maximumf %26, %27 : vector<18x32xf32>
    %29 = vector.extract_strided_slice %28 {offsets = [0, 0], sizes = [2, 32], strides = [1, 1]} : vector<18x32xf32> to vector<2x32xf32>
    %c0_13 = arith.constant 0 : index
    %c0_14 = arith.constant 0 : index
    %c0_15 = arith.constant 0 : index
    %30 = vector.load %arg4[%c0_13, %c0_14, %c0_15] : memref<9x32x256xf32, #tpu.memory_space<vmem>>, vector<1x32x256xf32>
    %31 = vector.shape_cast %30 : vector<1x32x256xf32> to vector<32x256xf32>
    %cst_16 = arith.constant dense<0.000000e+00> : vector<2x256xf32>
    %32 = tpu.matmul %29, %31, %cst_16 {dimension_numbers = #tpu.dot_dimension_numbers<[1], [0], [0], [1], [0, 0, 1, 1], [], []>} : vector<2x32xf32>, vector<32x256xf32>, vector<2x256xf32> -> vector<2x256xf32>
    %33 = vector.extract_strided_slice %28 {offsets = [2, 0], sizes = [2, 32], strides = [1, 1]} : vector<18x32xf32> to vector<2x32xf32>
    %c1 = arith.constant 1 : index
    %c0_17 = arith.constant 0 : index
    %c0_18 = arith.constant 0 : index
    %34 = vector.load %arg4[%c1, %c0_17, %c0_18] : memref<9x32x256xf32, #tpu.memory_space<vmem>>, vector<1x32x256xf32>
    %35 = vector.shape_cast %34 : vector<1x32x256xf32> to vector<32x256xf32>
    %cst_19 = arith.constant dense<0.000000e+00> : vector<2x256xf32>
    %36 = tpu.matmul %33, %35, %cst_19 {dimension_numbers = #tpu.dot_dimension_numbers<[1], [0], [0], [1], [0, 0, 1, 1], [], []>} : vector<2x32xf32>, vector<32x256xf32>, vector<2x256xf32> -> vector<2x256xf32>
    %37 = arith.addf %32, %36 : vector<2x256xf32>
    %38 = vector.extract_strided_slice %28 {offsets = [4, 0], sizes = [2, 32], strides = [1, 1]} : vector<18x32xf32> to vector<2x32xf32>
    %c2 = arith.constant 2 : index
    %c0_20 = arith.constant 0 : index
    %c0_21 = arith.constant 0 : index
    %39 = vector.load %arg4[%c2, %c0_20, %c0_21] : memref<9x32x256xf32, #tpu.memory_space<vmem>>, vector<1x32x256xf32>
    %40 = vector.shape_cast %39 : vector<1x32x256xf32> to vector<32x256xf32>
    %cst_22 = arith.constant dense<0.000000e+00> : vector<2x256xf32>
    %41 = tpu.matmul %38, %40, %cst_22 {dimension_numbers = #tpu.dot_dimension_numbers<[1], [0], [0], [1], [0, 0, 1, 1], [], []>} : vector<2x32xf32>, vector<32x256xf32>, vector<2x256xf32> -> vector<2x256xf32>
    %42 = arith.addf %37, %41 : vector<2x256xf32>
    %43 = vector.extract_strided_slice %28 {offsets = [6, 0], sizes = [2, 32], strides = [1, 1]} : vector<18x32xf32> to vector<2x32xf32>
    %c3 = arith.constant 3 : index
    %c0_23 = arith.constant 0 : index
    %c0_24 = arith.constant 0 : index
    %44 = vector.load %arg4[%c3, %c0_23, %c0_24] : memref<9x32x256xf32, #tpu.memory_space<vmem>>, vector<1x32x256xf32>
    %45 = vector.shape_cast %44 : vector<1x32x256xf32> to vector<32x256xf32>
    %cst_25 = arith.constant dense<0.000000e+00> : vector<2x256xf32>
    %46 = tpu.matmul %43, %45, %cst_25 {dimension_numbers = #tpu.dot_dimension_numbers<[1], [0], [0], [1], [0, 0, 1, 1], [], []>} : vector<2x32xf32>, vector<32x256xf32>, vector<2x256xf32> -> vector<2x256xf32>
    %47 = arith.addf %42, %46 : vector<2x256xf32>
    %48 = vector.extract_strided_slice %28 {offsets = [8, 0], sizes = [2, 32], strides = [1, 1]} : vector<18x32xf32> to vector<2x32xf32>
    %c4 = arith.constant 4 : index
    %c0_26 = arith.constant 0 : index
    %c0_27 = arith.constant 0 : index
    %49 = vector.load %arg4[%c4, %c0_26, %c0_27] : memref<9x32x256xf32, #tpu.memory_space<vmem>>, vector<1x32x256xf32>
    %50 = vector.shape_cast %49 : vector<1x32x256xf32> to vector<32x256xf32>
    %cst_28 = arith.constant dense<0.000000e+00> : vector<2x256xf32>
    %51 = tpu.matmul %48, %50, %cst_28 {dimension_numbers = #tpu.dot_dimension_numbers<[1], [0], [0], [1], [0, 0, 1, 1], [], []>} : vector<2x32xf32>, vector<32x256xf32>, vector<2x256xf32> -> vector<2x256xf32>
    %52 = arith.addf %47, %51 : vector<2x256xf32>
    %53 = vector.extract_strided_slice %28 {offsets = [10, 0], sizes = [2, 32], strides = [1, 1]} : vector<18x32xf32> to vector<2x32xf32>
    %c5 = arith.constant 5 : index
    %c0_29 = arith.constant 0 : index
    %c0_30 = arith.constant 0 : index
    %54 = vector.load %arg4[%c5, %c0_29, %c0_30] : memref<9x32x256xf32, #tpu.memory_space<vmem>>, vector<1x32x256xf32>
    %55 = vector.shape_cast %54 : vector<1x32x256xf32> to vector<32x256xf32>
    %cst_31 = arith.constant dense<0.000000e+00> : vector<2x256xf32>
    %56 = tpu.matmul %53, %55, %cst_31 {dimension_numbers = #tpu.dot_dimension_numbers<[1], [0], [0], [1], [0, 0, 1, 1], [], []>} : vector<2x32xf32>, vector<32x256xf32>, vector<2x256xf32> -> vector<2x256xf32>
    %57 = arith.addf %52, %56 : vector<2x256xf32>
    %58 = vector.extract_strided_slice %28 {offsets = [12, 0], sizes = [2, 32], strides = [1, 1]} : vector<18x32xf32> to vector<2x32xf32>
    %c6 = arith.constant 6 : index
    %c0_32 = arith.constant 0 : index
    %c0_33 = arith.constant 0 : index
    %59 = vector.load %arg4[%c6, %c0_32, %c0_33] : memref<9x32x256xf32, #tpu.memory_space<vmem>>, vector<1x32x256xf32>
    %60 = vector.shape_cast %59 : vector<1x32x256xf32> to vector<32x256xf32>
    %cst_34 = arith.constant dense<0.000000e+00> : vector<2x256xf32>
    %61 = tpu.matmul %58, %60, %cst_34 {dimension_numbers = #tpu.dot_dimension_numbers<[1], [0], [0], [1], [0, 0, 1, 1], [], []>} : vector<2x32xf32>, vector<32x256xf32>, vector<2x256xf32> -> vector<2x256xf32>
    %62 = arith.addf %57, %61 : vector<2x256xf32>
    %63 = vector.extract_strided_slice %28 {offsets = [14, 0], sizes = [2, 32], strides = [1, 1]} : vector<18x32xf32> to vector<2x32xf32>
    %c7 = arith.constant 7 : index
    %c0_35 = arith.constant 0 : index
    %c0_36 = arith.constant 0 : index
    %64 = vector.load %arg4[%c7, %c0_35, %c0_36] : memref<9x32x256xf32, #tpu.memory_space<vmem>>, vector<1x32x256xf32>
    %65 = vector.shape_cast %64 : vector<1x32x256xf32> to vector<32x256xf32>
    %cst_37 = arith.constant dense<0.000000e+00> : vector<2x256xf32>
    %66 = tpu.matmul %63, %65, %cst_37 {dimension_numbers = #tpu.dot_dimension_numbers<[1], [0], [0], [1], [0, 0, 1, 1], [], []>} : vector<2x32xf32>, vector<32x256xf32>, vector<2x256xf32> -> vector<2x256xf32>
    %67 = arith.addf %62, %66 : vector<2x256xf32>
    %68 = vector.extract_strided_slice %28 {offsets = [16, 0], sizes = [2, 32], strides = [1, 1]} : vector<18x32xf32> to vector<2x32xf32>
    %c8 = arith.constant 8 : index
    %c0_38 = arith.constant 0 : index
    %c0_39 = arith.constant 0 : index
    %69 = vector.load %arg4[%c8, %c0_38, %c0_39] : memref<9x32x256xf32, #tpu.memory_space<vmem>>, vector<1x32x256xf32>
    %70 = vector.shape_cast %69 : vector<1x32x256xf32> to vector<32x256xf32>
    %cst_40 = arith.constant dense<0.000000e+00> : vector<2x256xf32>
    %71 = tpu.matmul %68, %70, %cst_40 {dimension_numbers = #tpu.dot_dimension_numbers<[1], [0], [0], [1], [0, 0, 1, 1], [], []>} : vector<2x32xf32>, vector<32x256xf32>, vector<2x256xf32> -> vector<2x256xf32>
    %72 = arith.addf %67, %71 : vector<2x256xf32>
    %c0_41 = arith.constant 0 : index
    %c0_42 = arith.constant 0 : index
    %73 = vector.load %arg5[%c0_41, %c0_42] : memref<1x256xf32, #tpu.memory_space<vmem>>, vector<1x256xf32>
    %74 = vector.broadcast %73 : vector<1x256xf32> to vector<2x256xf32>
    %75 = arith.addf %72, %74 : vector<2x256xf32>
    %cst_43 = arith.constant 0.000000e+00 : f32
    %76 = vector.broadcast %cst_43 : f32 to vector<2x256xf32>
    %77 = arith.maximumf %75, %76 : vector<2x256xf32>
    %c0_44 = arith.constant 0 : index
    %c0_45 = arith.constant 0 : index
    %78 = vector.load %arg6[%c0_44, %c0_45] : memref<256x1xf32, #tpu.memory_space<vmem>>, vector<256x1xf32>
    %cst_46 = arith.constant dense<0.000000e+00> : vector<2x1xf32>
    %79 = tpu.matmul %77, %78, %cst_46 {dimension_numbers = #tpu.dot_dimension_numbers<[1], [0], [0], [1], [0, 0, 1, 1], [], []>} : vector<2x256xf32>, vector<256x1xf32>, vector<2x1xf32> -> vector<2x1xf32>
    %c0_47 = arith.constant 0 : index
    %c0_48 = arith.constant 0 : index
    %80 = vector.load %arg7[%c0_47, %c0_48] : memref<1x1xf32, #tpu.memory_space<vmem>>, vector<1x1xf32>
    %81 = vector.broadcast %80 : vector<1x1xf32> to vector<2x1xf32>
    %82 = arith.addf %79, %81 : vector<2x1xf32>
    %83 = math.tanh %82 : vector<2x1xf32>
    %c0_49 = arith.constant 0 : index
    %c0_50 = arith.constant 0 : index
    %84 = vector.load %arg8[%c0_49, %c0_50] : memref<2x1xf32, #tpu.memory_space<vmem>>, vector<2x1xf32>
    tpu.vector_store %arg8[%c0_49, %c0_50], %83 {strides = array<i32>} : memref<2x1xf32, #tpu.memory_space<vmem>>, vector<2x1xf32>,
    return
  }
}

</mosaic_0001>

<bundles_post_ra>
// kernel: value_head_forward.1
= control target key start
LH: loop header
LB: loop body
LE: loop exit
PB: predicated region body
PF: predicated region fallthrough
CT: control target
= control target key end

     0   :  { %s1169_s0 = inlined_call_operand.vmem [shape: f32[18,256], index: 0, kind: input, shape index: {}]   ;;  %s1170_s1 = inlined_call_operand.vmem [shape: f32[256,32], index: 1, kind: input, shape index: {}]   ;;  %s1171_s2 = inlined_call_operand.vmem [shape: f32[1,32], index: 2, kind: input, shape index: {}]   ;;  %s1172_s3 = inlined_call_operand.vmem [shape: f32[1,32], index: 3, kind: input, shape index: {}]   ;;  %s1173_s4 = inlined_call_operand.hbm [shape: f32[9,32,256], index: 4, kind: input, shape index: {}]   ;;  %s1174_s5 = inlined_call_operand.vmem [shape: f32[1,256], index: 5, kind: input, shape index: {}]   ;;  %s1175_s6 = inlined_call_operand.vmem [shape: f32[256,1], index: 6, kind: input, shape index: {}]   ;;  %s1176_s7 = inlined_call_operand.<no memory space> [shape: f32[1,1], index: 7, kind: input, shape index: {}]   ;;  %s1177_s8 = inlined_call_operand.vmem [shape: f32[2,1], index: 8, kind: output, shape index: {}]  }
   0x1   :  { %v13_v0 = vstv %s1176_s7 }
   0x2   :  { %14 = vst [vmem:[#allocation2] sm:$0x1] %v13_v0 }
   0x3   :  { %15 = vsyncpa [#allocation4], 0  ;;  %s28_s9 = sshll.u32 %s1173_s4, 4  ;;  %s839_s10 = smov [#allocation3]   ;;  %s29_s9 = int_to_ptr.hbm [resolvable:$true] %s28_s9 }
   0x4   :  { %s30_s11 = sshll.u32 %s839_s10, 4  ;;  %s840_s12 = smov 256   ;;  %s31_s11 = int_to_ptr.vmem [resolvable:$true] %s30_s11 }
   0x5   :  { %s841_s13 = smov 16  }
   0x6   :  { %36 = dma.hbm_to_vmem [thread:$0]  %s29_s9, 9216, %s31_s11, [#allocation4], %s840_s12, %s840_s12, %s841_s13  }
   0x7   :  { %837 = dma.done.wait [#allocation4], 9216  }
   0x8   :  { %838 = vsyncadd [#allocation4], 4294958080  ;;  %v68_v1 = vld [vmem:[%s1170_s1 + $0x78] sm:$0xff]  ;;  %v67_v3 = vld [vmem:[%s1170_s1 + $0x70] sm:$0xff]  ;;  %v842_v41 = vmov 18.0   ;;  %vm137_vm0 = vcmask 261120  }
   0x9   :  { %v84_v2 = vld [vmem:[%s1170_s1 + $0xf8] sm:$0xff]  ;;  %85 = vmatpush.msra.mxu0 %v68_v1  ;;  %v83_v4 = vld [vmem:[%s1170_s1 + $0xf0] sm:$0xff]  ;;  %v66_v5 = vld [vmem:[%s1170_s1 + $0x68] sm:$0xff]  ;;  %807 = vrcp.f32 %v842_v41  ;;  %vm141_vm1 = vcmask 254976   ;;  %vm775_vm6 = vcmask 1024  }
   0xa   :  { %111 = vmatpush.msra.mxu1 %v84_v2  ;;  %v82_v6 = vld [vmem:[%s1170_s1 + $0xe8] sm:$0xff]  ;;  %v65_v7 = vld [vmem:[%s1170_s1 + $0x60] sm:$0xff]  ;;  %v64_v9 = vld [vmem:[%s1170_s1 + $0x58] sm:$0xff] }
   0xb   :  { %86 = vmatpush.msra.mxu0 %v67_v3  ;;  %v81_v8 = vld [vmem:[%s1170_s1 + $0xe0] sm:$0xff]  ;;  %v80_v10 = vld [vmem:[%s1170_s1 + $0xd8] sm:$0xff]  ;;  %v63_v11 = vld [vmem:[%s1170_s1 + $0x50] sm:$0xff] }
   0xc   :  { %112 = vmatpush.msra.mxu1 %v83_v4  ;;  %v79_v12 = vld [vmem:[%s1170_s1 + $0xd0] sm:$0xff]  ;;  %v62_v13 = vld [vmem:[%s1170_s1 + $0x48] sm:$0xff]  ;;  %v61_v15 = vld [vmem:[%s1170_s1 + $0x40] sm:$0xff] }
   0xd   :  { %87 = vmatpush.msra.mxu0 %v66_v5  ;;  %v78_v14 = vld [vmem:[%s1170_s1 + $0xc8] sm:$0xff]  ;;  %v77_v16 = vld [vmem:[%s1170_s1 + $0xc0] sm:$0xff]  ;;  %v60_v17 = vld [vmem:[%s1170_s1 + $0x38] sm:$0xff] }
   0xe   :  { %113 = vmatpush.msra.mxu1 %v82_v6  ;;  %v76_v18 = vld [vmem:[%s1170_s1 + $0xb8] sm:$0xff]  ;;  %v59_v19 = vld [vmem:[%s1170_s1 + $0x30] sm:$0xff]  ;;  %v58_v21 = vld [vmem:[%s1170_s1 + $0x28] sm:$0xff] }
   0xf   :  { %88 = vmatpush.msra.mxu0 %v65_v7  ;;  %v75_v20 = vld [vmem:[%s1170_s1 + $0xb0] sm:$0xff]  ;;  %v74_v22 = vld [vmem:[%s1170_s1 + $0xa8] sm:$0xff]  ;;  %v57_v23 = vld [vmem:[%s1170_s1 + $0x20] sm:$0xff]  ;;  %v808_v45 = vpop.eup %807 }
  0x10   :  { %114 = vmatpush.msra.mxu1 %v81_v8  ;;  %v73_v24 = vld [vmem:[%s1170_s1 + $0xa0] sm:$0xff]  ;;  %v56_v25 = vld [vmem:[%s1170_s1 + $0x18] sm:$0xff]  ;;  %v55_v27 = vld [vmem:[%s1170_s1 + $0x10] sm:$0xff]  ;;  %v151_v48 = vmul.f32 18.0, %v808_v45  ;;  %vm155_vm2 = vweird.f32 %v808_v45 }
  0x11   :  { %89 = vmatpush.msra.mxu0 %v64_v9  ;;  %v72_v26 = vld [vmem:[%s1170_s1 + $0x98] sm:$0xff]  ;;  %v71_v28 = vld [vmem:[%s1170_s1 + $0x90] sm:$0xff]  ;;  %v54_v29 = vld [vmem:[%s1170_s1 + $0x8] sm:$0xff] }
  0x12   :  { %115 = vmatpush.msra.mxu1 %v80_v10  ;;  %v70_v30 = vld [vmem:[%s1170_s1 + $0x88] sm:$0xff]  ;;  %v53_v31 = vld [vmem:[%s1170_s1] sm:$0xff]  ;;  %v49_v35 = vld [vmem:[%s1169_s0 + $0x10] sm:$0xff]  ;;  %v152_v55 = vsub.f32 1.0, %v151_v48 }
  0x13   :  { %90 = vmatpush.msra.mxu0 %v63_v11  ;;  %v69_v32 = vld [vmem:[%s1170_s1 + $0x80] sm:$0xff]  ;;  %v48_v34 = vld [vmem:[%s1169_s0 + $0x8] sm:$0xff]  ;;  %v50_v36 = vld [vmem:[%s1169_s0 + $0x18] sm:$0xff] }
  0x14   :  { %116 = vmatpush.msra.mxu1 %v79_v12  ;;  %v47_v33 = vld [vmem:[%s1169_s0] sm:$0xff]  ;;  %v52_v38 = vld [vmem:[%s1169_s0 + $0x28] sm:$0x3]  ;;  %v153_v58 = vmul.f32 %v808_v45, %v152_v55  ;;  %v533_v41 = vld [vmem:[#allocation3 + $0x1b0] sm:$0xff] }
  0x15   :  { %91 = vmatpush.msra.mxu0 %v62_v13  ;;  %v51_v37 = vld [vmem:[%s1169_s0 + $0x20] sm:$0x3] }
  0x16   :  { %117 = vmatpush.msra.mxu1 %v78_v14  ;;  %v154_v61 = vadd.f32 %v808_v45, %v153_v58  ;;  %v311_v48 = vld [vmem:[#allocation3 + $0x80] sm:$0xff] }
  0x17   :  { %92 = vmatpush.msra.mxu0 %v61_v15 }
  0x18   :  { %118 = vmatpush.msra.mxu1 %v77_v16  ;;  %v156_v0 = vsel %vm155_vm2, %v808_v45, %v154_v61  ;;  %v213_v16 = vld [vmem:[#allocation3 + $0x30] sm:$0xff] }
  0x19   :  { %93 = vmatpush.msra.mxu0 %v60_v17  ;;  %v214_v17 = vld [vmem:[#allocation3 + $0x38] sm:$0xff]  ;;  %282 = vmatpush.msra.mxu2 %v213_v16  ;;  %v639_v16 = vld [vmem:[#allocation3 + $0x220] sm:$0xff] }
  0x1a   :  { %119 = vmatpush.msra.mxu1 %v76_v18  ;;  %302 = vmatpush.msra.mxu3 %v214_v17  ;;  %v640_v17 = vld [vmem:[#allocation3 + $0x228] sm:$0xff] }
  0x1b   :  { %94 = vmatpush.msra.mxu0 %v59_v19  ;;  %v222_v19 = vld [vmem:[#allocation3 + $0x70] sm:$0xff] }
  0x1c   :  { %120 = vmatpush.msra.mxu1 %v75_v20  ;;  %v223_v20 = vld [vmem:[#allocation3 + $0x78] sm:$0xff] }
  0x1d   :  { %95 = vmatpush.msra.mxu0 %v58_v21  ;;  %v211_v21 = vld [vmem:[#allocation3 + $0x20] sm:$0xff] }
  0x1e   :  { %121 = vmatpush.msra.mxu1 %v74_v22  ;;  %v212_v22 = vld [vmem:[#allocation3 + $0x28] sm:$0xff]  ;;  %283 = vmatpush.msra.mxu2 %v211_v21 }
  0x1f   :  { %96 = vmatpush.msra.mxu0 %v57_v23  ;;  %303 = vmatpush.msra.mxu3 %v212_v22  ;;  %v366_v21 = vld [vmem:[#allocation3 + $0xc8] sm:$0xff] }
  0x20   :  { %122 = vmatpush.msra.mxu1 %v73_v24  ;;  %v220_v24 = vld [vmem:[#allocation3 + $0x60] sm:$0xff] }
  0x21   :  { %97 = vmatpush.msra.mxu0 %v56_v25  ;;  %v221_v25 = vld [vmem:[#allocation3 + $0x68] sm:$0xff] }
  0x22   :  { %123 = vmatpush.msra.mxu1 %v72_v26  ;;  %v209_v26 = vld [vmem:[#allocation3 + $0x10] sm:$0xff] }
  0x23   :  { %98 = vmatpush.msra.mxu0 %v55_v27  ;;  %v210_v27 = vld [vmem:[#allocation3 + $0x18] sm:$0xff]  ;;  %284 = vmatpush.msra.mxu2 %v209_v26  ;;  %v425_v26 = vld [vmem:[#allocation3 + $0x130] sm:$0xff] }
  0x24   :  { %124 = vmatpush.msra.mxu1 %v71_v28  ;;  %304 = vmatpush.msra.mxu3 %v210_v27  ;;  %v426_v27 = vld [vmem:[#allocation3 + $0x138] sm:$0xff] }
  0x25   :  { %99 = vmatpush.msra.mxu0 %v54_v29  ;;  %v218_v29 = vld [vmem:[#allocation3 + $0x50] sm:$0xff] }
  0x26   :  { %125 = vmatpush.msra.mxu1 %v70_v30  ;;  %v219_v30 = vld [vmem:[#allocation3 + $0x58] sm:$0xff] }
  0x27   :  { %100 = vmatpush.msra.mxu0 %v53_v31  ;;  %v207_v31 = vld [vmem:[#allocation3] sm:$0xff] }
  0x28   :  { %126 = vmatpush.msra.mxu1 %v69_v32  ;;  %101 = vmatmul.f32.vlgmr.msra.gmra.mxu0 %v47_v33  ;;  %v208_v32 = vld [vmem:[#allocation3 + $0x8] sm:$0xff] }
  0x29   :  { %127 = vmatmul.f32.vlgmr.msra.gmra.mxu1 %v48_v34  ;;  %240 = vmatpush.msrb.mxu0 %v222_v19  ;;  %v317_v34 = vld [vmem:[#allocation3 + $0xb0] sm:$0xff] }
  0x2a   :  { %260 = vmatpush.msrb.mxu1 %v223_v20  ;;  %285 = vmatpush.msra.mxu2 %v207_v31  ;;  %v365_v20 = vld [vmem:[#allocation3 + $0xc0] sm:$0xff]  ;;  %v424_v31 = vld [vmem:[#allocation3 + $0x128] sm:$0xff] }
  0x2b   :  { %241 = vmatpush.msrb.mxu0 %v220_v24  ;;  %305 = vmatpush.msra.mxu3 %v208_v32  ;;  %v638_v24 = vld [vmem:[#allocation3 + $0x218] sm:$0xff] }
  0x2c   :  { %261 = vmatpush.msrb.mxu1 %v221_v25  ;;  %334 = vmatpush.msrb.mxu2 %v317_v34  ;;  %v422_v34 = vld [vmem:[#allocation3 + $0x118] sm:$0xff] }
  0x2d   :  { %242 = vmatpush.msrb.mxu0 %v218_v29  ;;  %v636_v29 = vld [vmem:[#allocation3 + $0x208] sm:$0xff] }
  0x2e   :  { %262 = vmatpush.msrb.mxu1 %v219_v30  ;;  %v423_v30 = vld [vmem:[#allocation3 + $0x120] sm:$0xff] }
  0x30   :  { %104 = vmatmul.f32.gmra.mxu0 %v49_v35  ;;  %v216_v35 = vld [vmem:[#allocation3 + $0x40] sm:$0xff] }
  0x31   :  { %130 = vmatmul.f32.gmra.mxu1 %v50_v36  ;;  %v217_v36 = vld [vmem:[#allocation3 + $0x48] sm:$0xff]  ;;  %243 = vmatpush.msrb.mxu0 %v216_v35 }
  0x32   :  { %263 = vmatpush.msrb.mxu1 %v217_v36  ;;  %v419_v36 = vld [vmem:[#allocation3 + $0x100] sm:$0xff] }
  0x33   :  { %550 = vmatpush.msra.mxu0 %v533_v41  ;;  %v477_v41 = vld [vmem:[#allocation3 + $0x160] sm:$0xff] }
  0x38   :  { %107 = vmatmul.f32.gmra.mxu0 %v51_v37  ;;  %v318_v37 = vld [vmem:[#allocation3 + $0xb8] sm:$0xff] }
  0x39   :  { %133 = vmatmul.f32.gmra.mxu1 %v52_v38  ;;  %354 = vmatpush.msrb.mxu3 %v318_v37  ;;  %v420_v37 = vld [vmem:[#allocation3 + $0x108] sm:$0xff] }
  0xa5   :  { %v102_v39 = vpop.f32.mrf.mxu0 }
  0xa6   :  { %v128_v40 = vpop.f32.mrf.mxu1 }
  0xa7   :  { %v129_v46 = vadd.f32 %v128_v40, %v102_v39  ;;  %v315_v39 = vld [vmem:[#allocation3 + $0xa0] sm:$0xff]  ;;  %v316_v40 = vld [vmem:[#allocation3 + $0xa8] sm:$0xff] }
  0xa8   :  { %335 = vmatpush.msrb.mxu2 %v315_v39  ;;  %355 = vmatpush.msrb.mxu3 %v316_v40  ;;  %v479_v39 = vld [vmem:[#allocation3 + $0x170] sm:$0xff]  ;;  %v480_v40 = vld [vmem:[#allocation3 + $0x178] sm:$0xff] }
  0xa9   :  { %v138_v51 = vsel %vm137_vm0, %v129_v46, 0.0 }
  0xad   :  { %v105_v42 = vpop.f32.mrf.mxu0 }
  0xae   :  { %v131_v43 = vpop.f32.mrf.mxu1 }
  0xaf   :  { %v132_v44 = vadd.f32 %v131_v43, %v105_v42  ;;  %v534_v42 = vld [vmem:[#allocation3 + $0x1b8] sm:$0xff]  ;;  %v313_v43 = vld [vmem:[#allocation3 + $0x90] sm:$0xff] }
  0xb0   :  { %570 = vmatpush.msra.mxu1 %v534_v42  ;;  %336 = vmatpush.msrb.mxu2 %v313_v43  ;;  %v478_v42 = vld [vmem:[#allocation3 + $0x168] sm:$0xff]  ;;  %v475_v43 = vld [vmem:[#allocation3 + $0x150] sm:$0xff] }
  0xb1   :  { %v139_v47 = vsel %vm137_vm0, %v132_v44, 0.0 }
  0xb2   :  { %v140_v53 = vadd.f32 %v139_v47, %v138_v51  ;;  %v532_v47 = vld [vmem:[#allocation3 + $0x1a8] sm:$0xff]  ;;  %v530_v51 = vld [vmem:[#allocation3 + $0x198] sm:$0xff]  ;;  %337 = vmatpush.msrb.mxu2 %v311_v48 }
  0xb3   :  { %571 = vmatpush.msra.mxu1 %v532_v47  ;;  %v587_v47 = vld [vmem:[#allocation3 + $0x1f0] sm:$0xff]  ;;  %v588_v48 = vld [vmem:[#allocation3 + $0x1f8] sm:$0xff] }
  0xb5   :  { %v108_v49 = vpop.f32.mrf.mxu0  ;;  %572 = vmatpush.msra.mxu1 %v530_v51  ;;  %v583_v51 = vld [vmem:[#allocation3 + $0x1d0] sm:$0xff] }
  0xb6   :  { %v134_v50 = vpop.f32.mrf.mxu1 }
  0xb7   :  { %v135_v52 = vadd.f32 %v134_v50, %v108_v49  ;;  %v312_v49 = vld [vmem:[#allocation3 + $0x88] sm:$0xff]  ;;  %v529_v50 = vld [vmem:[#allocation3 + $0x190] sm:$0xff] }
  0xb9   :  { %v142_v54 = vsel %vm141_vm1, %v135_v52, 0.0 }
  0xba   :  { %v143_v56 = vadd.f32 %v142_v54, %v140_v53  ;;  %v528_v53 = vld [vmem:[#allocation3 + $0x188] sm:$0xff] }
  0xbb   :  { %573 = vmatpush.msra.mxu1 %v528_v53 }
  0xbc   :  { %v144_v57 = vrot.slane %v143_v56, 4 }
  0xbe   :  { %v145_v59 = vadd.f32 %v144_v57, %v143_v56 }
  0xc0   :  { %v146_v60 = vrot.slane %v145_v59, 2 }
  0xc2   :  { %v147_v62 = vadd.f32 %v146_v60, %v145_v59  ;;  %v804_v60 = vld [vmem:[%s1171_s2] ss:$0 sm:$0xff] }
  0xc4   :  { %v148_v63 = vrot.slane %v147_v62, 1 }
  0xc6   :  { %v149_v1 = vadd.f32 %v148_v63, %v147_v62 }
  0xc8   :  { %v157_v2 = vmul.f32 %v156_v0, %v149_v1 }
  0xca   :  { %v1011_v3 = vsub.f32 %v129_v46, %v157_v2  ;;  %v1013_v4 = vsub.f32 %v132_v44, %v157_v2  ;;  %v1015_v5 = vsub.f32 %v135_v52, %v157_v2  ;;  %v314_v44 = vld [vmem:[#allocation3 + $0x98] sm:$0xff]  ;;  %v531_v46 = vld [vmem:[#allocation3 + $0x1a0] sm:$0xff] }
  0xcb   :  { %551 = vmatpush.msra.mxu0 %v531_v46  ;;  %356 = vmatpush.msrb.mxu3 %v314_v44  ;;  %v527_v52 = vld [vmem:[#allocation3 + $0x180] sm:$0xff]  ;;  %v476_v44 = vld [vmem:[#allocation3 + $0x158] sm:$0xff]  ;;  %v474_v46 = vld [vmem:[#allocation3 + $0x148] sm:$0xff] }
  0xcc   :  { %v161_v6 = vmul.f32 %v1011_v3, %v1011_v3  ;;  %v162_v7 = vmul.f32 %v1013_v4, %v1013_v4  ;;  %v163_v8 = vmul.f32 %v1015_v5, %v1015_v5 }
  0xcd   :  { %552 = vmatpush.msra.mxu0 %v529_v50  ;;  %357 = vmatpush.msrb.mxu3 %v312_v49  ;;  %v585_v49 = vld [vmem:[#allocation3 + $0x1e0] sm:$0xff]  ;;  %v586_v50 = vld [vmem:[#allocation3 + $0x1e8] sm:$0xff] }
  0xce   :  { %v164_v9 = vsel %vm137_vm0, %v161_v6, 0.0  ;;  %v165_v10 = vsel %vm137_vm0, %v162_v7, 0.0  ;;  %v167_v12 = vsel %vm141_vm1, %v163_v8, 0.0  ;;  %v371_v8 = vld [vmem:[#allocation3 + $0xf0] sm:$0xff] }
  0xcf   :  { %v166_v11 = vadd.f32 %v165_v10, %v164_v9  ;;  %553 = vmatpush.msra.mxu0 %v527_v52  ;;  %v372_v9 = vld [vmem:[#allocation3 + $0xf8] sm:$0xff] }
  0xd0   :  { %v584_v52 = vld [vmem:[#allocation3 + $0x1d8] sm:$0xff] }
  0xd1   :  { %v168_v13 = vadd.f32 %v167_v12, %v166_v11  ;;  %v370_v11 = vld [vmem:[#allocation3 + $0xe8] sm:$0xff]  ;;  %v641_v12 = vld [vmem:[#allocation3 + $0x230] sm:$0xff] }
  0xd3   :  { %v169_v14 = vrot.slane %v168_v13, 4 }
  0xd5   :  { %v170_v15 = vadd.f32 %v169_v14, %v168_v13  ;;  %v642_v13 = vld [vmem:[#allocation3 + $0x238] sm:$0xff]  ;;  %v367_v14 = vld [vmem:[#allocation3 + $0xd0] sm:$0xff] }
  0xd7   :  { %v171_v18 = vrot.slane %v170_v15, 2 }
  0xd9   :  { %v172_v23 = vadd.f32 %v171_v18, %v170_v15  ;;  %v368_v15 = vld [vmem:[#allocation3 + $0xd8] sm:$0xff] }
  0xdb   :  { %v173_v28 = vrot.slane %v172_v23, 1 }
  0xdd   :  { %v174_v33 = vadd.f32 %v173_v28, %v172_v23  ;;  %v637_v23 = vld [vmem:[#allocation3 + $0x210] sm:$0xff]  ;;  %v635_v28 = vld [vmem:[#allocation3 + $0x200] sm:$0xff] }
  0xdf   :  { %v175_v38 = vmul.f32 %v174_v33, %v156_v0  ;;  %v805_v0 = vld [vmem:[%s1172_s3] ss:$0 sm:$0xff]  ;;  %v421_v33 = vld [vmem:[#allocation3 + $0x110] sm:$0xff] }
  0xe1   :  { %v176_v45 = vadd.f32 1e-05, %v175_v38 }
  0xe3   :  { %809 = vrsqrt.f32 %v176_v45  ;;  %vm183_vm4 = vweird.f32 %v176_v45 }
  0xe9   :  { %v810_v54 = vpop.eup %809 }
  0xea   :  { %v178_v55 = vmul.f32 %v810_v54, %v176_v45  ;;  %vm184_vm3 = vweird.f32 %v810_v54  ;;  %v473_v45 = vld [vmem:[#allocation3 + $0x140] sm:$0xff] }
  0xeb   :  { %vm185_vm5 = vmor %vm183_vm4, %vm184_vm3 }
  0xec   :  { %v179_v56 = vmul.f32 %v810_v54, %v178_v55  ;;  %v582_v55 = vld [vmem:[#allocation3 + $0x1c8] sm:$0xff] }
  0xee   :  { %v180_v57 = vmul.f32 0.5, %v179_v56 }
  0xf0   :  { %v181_v58 = vsub.f32 1.5, %v180_v57  ;;  %v713_v57 = vld [vmem:[%s1175_s6 + $0x78] sm:$0xff] }
  0xf2   :  { %v182_v59 = vmul.f32 %v810_v54, %v181_v58  ;;  %v729_v58 = vld [vmem:[%s1175_s6 + $0xf8] sm:$0xff] }
  0xf4   :  { %v186_v61 = vsel %vm185_vm5, %v810_v54, %v182_v59  ;;  %v581_v54 = vld [vmem:[#allocation3 + $0x1c0] sm:$0xff]  ;;  %v712_v59 = vld [vmem:[%s1175_s6 + $0x70] sm:$0xff] }
  0xf5   :  { %v187_v62 = vmul.f32 %v186_v61, %v1011_v3  ;;  %v188_v63 = vmul.f32 %v186_v61, %v1013_v4  ;;  %v369_v4 = vld [vmem:[#allocation3 + $0xe0] sm:$0xff]  ;;  %v189_v18 = vmul.f32 %v186_v61, %v1015_v5 }
  0xf6   :  { %v711_v61 = vld [vmem:[%s1175_s6 + $0x68] sm:$0xff] }
  0xf7   :  { %v194_v1 = vmul.f32 %v804_v60, %v187_v62  ;;  %v195_v2 = vmul.f32 %v804_v60, %v188_v63  ;;  %v196_v25 = vmul.f32 %v804_v60, %v189_v18  ;;  %v728_v60 = vld [vmem:[%s1175_s6 + $0xf0] sm:$0xff]  ;;  %v727_v62 = vld [vmem:[%s1175_s6 + $0xe8] sm:$0xff]  ;;  %v710_v63 = vld [vmem:[%s1175_s6 + $0x60] sm:$0xff] }
  0xf9   :  { %v201_v6 = vadd.f32 %v805_v0, %v194_v1  ;;  %v202_v10 = vadd.f32 %v805_v0, %v195_v2  ;;  %v203_v32 = vadd.f32 %v805_v0, %v196_v25  ;;  %v726_v0 = vld [vmem:[%s1175_s6 + $0xe0] sm:$0xff]  ;;  %v709_v1 = vld [vmem:[%s1175_s6 + $0x58] sm:$0xff]  ;;  %v716_v25 = vld [vmem:[%s1175_s6 + $0x90] sm:$0xff] }
  0xfa   :  { %v725_v2 = vld [vmem:[%s1175_s6 + $0xd8] sm:$0xff] }
  0xfb   :  { %v1034_v7 = vmax.f32 %v201_v6, 0.0  ;;  %v1044_v19 = vmax.f32 %v202_v10, 0.0  ;;  %v206_v38 = vmax.f32 %v203_v32, 0.0  ;;  %v708_v6 = vld [vmem:[%s1175_s6 + $0x50] sm:$0xff] }
  0xfd   :  { %784 = vmatmul.msk.f32.vlgmr.msra.gmra.mxu2 %vm137_vm0, %v1034_v7  ;;  %785 = vmatmul.msk.f32.vlgmr.msra.gmra.mxu3 %vm137_vm0, %v1034_v7  ;;  %v225_v3 = vrot.slane %v1034_v7, 2  ;;  %v319_v22 = vrot.slane %v1034_v7, 4  ;;  %v535_v5 = vrot.slane %v1044_v19, 4  ;;  %v373_v35 = vrot.slane %v1034_v7, 6  ;;  %v724_v7 = vld [vmem:[%s1175_s6 + $0xd0] sm:$0xff] }
  0xfe   :  { %388 = vmatpush.msra.mxu2 %v371_v8  ;;  %408 = vmatpush.msra.mxu3 %v372_v9  ;;  %v481_v53 = vrot.slane %v1044_v19, 2  ;;  %v589_v56 = vrot.slane %v1044_v19, 6  ;;  %v707_v8 = vld [vmem:[%s1175_s6 + $0x48] sm:$0xff] }
  0xff   :  { %782 = vmatmul.msk.f32.vlgmr.msrb.gmra.mxu0 %vm137_vm0, %v225_v3  ;;  %783 = vmatmul.msk.f32.vlgmr.msrb.gmra.mxu1 %vm137_vm0, %v225_v3  ;;  %v723_v9 = vld [vmem:[%s1175_s6 + $0xc8] sm:$0xff] }
 0x100   :  { %389 = vmatpush.msra.mxu2 %v369_v4  ;;  %409 = vmatpush.msra.mxu3 %v370_v11  ;;  %v706_v4 = vld [vmem:[%s1175_s6 + $0x40] sm:$0xff] }
 0x101   :  { %658 = vmatpush.msrb.mxu0 %v641_v12  ;;  %678 = vmatpush.msrb.mxu1 %v642_v13  ;;  %v722_v11 = vld [vmem:[%s1175_s6 + $0xc0] sm:$0xff]  ;;  %v705_v12 = vld [vmem:[%s1175_s6 + $0x38] sm:$0xff] }
 0x102   :  { %390 = vmatpush.msra.mxu2 %v367_v14  ;;  %410 = vmatpush.msra.mxu3 %v368_v15  ;;  %v721_v13 = vld [vmem:[%s1175_s6 + $0xb8] sm:$0xff]  ;;  %v704_v14 = vld [vmem:[%s1175_s6 + $0x30] sm:$0xff] }
 0x103   :  { %659 = vmatpush.msrb.mxu0 %v639_v16  ;;  %679 = vmatpush.msrb.mxu1 %v640_v17  ;;  %v720_v15 = vld [vmem:[%s1175_s6 + $0xb0] sm:$0xff]  ;;  %v703_v16 = vld [vmem:[%s1175_s6 + $0x28] sm:$0xff] }
 0x104   :  { %391 = vmatpush.msra.mxu2 %v365_v20  ;;  %411 = vmatpush.msra.mxu3 %v366_v21  ;;  %v719_v17 = vld [vmem:[%s1175_s6 + $0xa8] sm:$0xff]  ;;  %v702_v20 = vld [vmem:[%s1175_s6 + $0x20] sm:$0xff] }
 0x105   :  { %786 = vmatmul.msk.f32.vlgmr.msrb.gmra.mxu2 %vm137_vm0, %v319_v22  ;;  %787 = vmatmul.msk.f32.vlgmr.msrb.gmra.mxu3 %vm137_vm0, %v319_v22  ;;  %v718_v21 = vld [vmem:[%s1175_s6 + $0xa0] sm:$0xff]  ;;  %v701_v22 = vld [vmem:[%s1175_s6 + $0x18] sm:$0xff] }
 0x106   :  { %660 = vmatpush.msrb.mxu0 %v637_v23  ;;  %680 = vmatpush.msrb.mxu1 %v638_v24  ;;  %v717_v23 = vld [vmem:[%s1175_s6 + $0x98] sm:$0xff]  ;;  %v700_v24 = vld [vmem:[%s1175_s6 + $0x10] sm:$0xff] }
 0x107   :  { %794 = vmatmul.msk.f32.vlgmr.msra.gmra.mxu0 %vm137_vm0, %v535_v5  ;;  %795 = vmatmul.msk.f32.vlgmr.msra.gmra.mxu1 %vm137_vm0, %v535_v5  ;;  %v699_v5 = vld [vmem:[%s1175_s6 + $0x8] sm:$0xff] }
 0x108   :  { %442 = vmatpush.msrb.mxu2 %v425_v26  ;;  %462 = vmatpush.msrb.mxu3 %v426_v27  ;;  %v715_v26 = vld [vmem:[%s1175_s6 + $0x88] sm:$0xff]  ;;  %v698_v27 = vld [vmem:[%s1175_s6] sm:$0xff] }
 0x109   :  { %661 = vmatpush.msrb.mxu0 %v635_v28  ;;  %681 = vmatpush.msrb.mxu1 %v636_v29  ;;  %v714_v28 = vld [vmem:[%s1175_s6 + $0x80] sm:$0xff] }
 0x10a   :  { %443 = vmatpush.msrb.mxu2 %v423_v30  ;;  %463 = vmatpush.msrb.mxu3 %v424_v31 }
 0x10c   :  { %444 = vmatpush.msrb.mxu2 %v421_v33  ;;  %464 = vmatpush.msrb.mxu3 %v422_v34 }
 0x10d   :  { %788 = vmatmul.msk.f32.vlgmr.msra.gmra.mxu2 %vm137_vm0, %v373_v35  ;;  %789 = vmatmul.msk.f32.vlgmr.msra.gmra.mxu3 %vm137_vm0, %v373_v35 }
 0x10e   :  { %445 = vmatpush.msrb.mxu2 %v419_v36  ;;  %465 = vmatpush.msrb.mxu3 %v420_v37 }
 0x10f   :  { %798 = vmatmul.msk.f32.vlgmr.msrb.gmra.mxu0 %vm137_vm0, %v206_v38  ;;  %799 = vmatmul.msk.f32.vlgmr.msrb.gmra.mxu1 %vm137_vm0, %v206_v38 }
 0x110   :  { %496 = vmatpush.msra.mxu2 %v479_v39  ;;  %516 = vmatpush.msra.mxu3 %v480_v40 }
 0x112   :  { %497 = vmatpush.msra.mxu2 %v477_v41  ;;  %517 = vmatpush.msra.mxu3 %v478_v42 }
 0x114   :  { %498 = vmatpush.msra.mxu2 %v475_v43  ;;  %518 = vmatpush.msra.mxu3 %v476_v44 }
 0x115   :  { %790 = vmatmul.msk.f32.vlgmr.msrb.gmra.mxu2 %vm137_vm0, %v1044_v19  ;;  %791 = vmatmul.msk.f32.vlgmr.msrb.gmra.mxu3 %vm137_vm0, %v1044_v19 }
 0x116   :  { %499 = vmatpush.msra.mxu2 %v473_v45  ;;  %519 = vmatpush.msra.mxu3 %v474_v46 }
 0x118   :  { %604 = vmatpush.msrb.mxu2 %v587_v47  ;;  %624 = vmatpush.msrb.mxu3 %v588_v48 }
 0x11a   :  { %605 = vmatpush.msrb.mxu2 %v585_v49  ;;  %625 = vmatpush.msrb.mxu3 %v586_v50  ;;  %v688_v49 = vld [vmem:[%s1174_s5] sm:$0x3] }
 0x11c   :  { %606 = vmatpush.msrb.mxu2 %v583_v51  ;;  %626 = vmatpush.msrb.mxu3 %v584_v52 }
 0x11d   :  { %792 = vmatmul.msk.f32.vlgmr.msra.gmra.mxu2 %vm137_vm0, %v481_v53  ;;  %793 = vmatmul.msk.f32.vlgmr.msra.gmra.mxu3 %vm137_vm0, %v481_v53 }
 0x11e   :  { %607 = vmatpush.msrb.mxu2 %v581_v54  ;;  %627 = vmatpush.msrb.mxu3 %v582_v55  ;;  %v690_v55 = vperm.slane %v688_v49, 0 }
 0x120   :  { %734 = vmatpush.msra.mxu2 %v713_v57  ;;  %754 = vmatpush.msra.mxu3 %v729_v58  ;;  %v691_v57 = vperm.slane %v688_v49, 1 }
 0x122   :  { %735 = vmatpush.msra.mxu2 %v712_v59  ;;  %755 = vmatpush.msra.mxu3 %v728_v60 }
 0x124   :  { %736 = vmatpush.msra.mxu2 %v711_v61  ;;  %756 = vmatpush.msra.mxu3 %v727_v62 }
 0x125   :  { %796 = vmatmul.msk.f32.vlgmr.msrb.gmra.mxu2 %vm137_vm0, %v589_v56  ;;  %797 = vmatmul.msk.f32.vlgmr.msrb.gmra.mxu3 %vm137_vm0, %v589_v56 }
 0x126   :  { %737 = vmatpush.msra.mxu2 %v710_v63  ;;  %757 = vmatpush.msra.mxu3 %v726_v0 }
 0x128   :  { %738 = vmatpush.msra.mxu2 %v709_v1  ;;  %758 = vmatpush.msra.mxu3 %v725_v2  ;;  %v806_v2 = vld [vmem:[#allocation2] ss:$0 sm:$0xff] }
 0x12a   :  { %739 = vmatpush.msra.mxu2 %v708_v6  ;;  %759 = vmatpush.msra.mxu3 %v724_v7 }
 0x12c   :  { %740 = vmatpush.msra.mxu2 %v707_v8  ;;  %760 = vmatpush.msra.mxu3 %v723_v9 }
 0x12e   :  { %741 = vmatpush.msra.mxu2 %v706_v4  ;;  %761 = vmatpush.msra.mxu3 %v722_v11 }
 0x130   :  { %742 = vmatpush.msra.mxu2 %v705_v12  ;;  %762 = vmatpush.msra.mxu3 %v721_v13 }
 0x132   :  { %743 = vmatpush.msra.mxu2 %v704_v14  ;;  %763 = vmatpush.msra.mxu3 %v720_v15 }
 0x134   :  { %744 = vmatpush.msra.mxu2 %v703_v16  ;;  %764 = vmatpush.msra.mxu3 %v719_v17 }
 0x136   :  { %745 = vmatpush.msra.mxu2 %v702_v20  ;;  %765 = vmatpush.msra.mxu3 %v718_v21 }
 0x138   :  { %746 = vmatpush.msra.mxu2 %v701_v22  ;;  %766 = vmatpush.msra.mxu3 %v717_v23 }
 0x13a   :  { %747 = vmatpush.msra.mxu2 %v700_v24  ;;  %767 = vmatpush.msra.mxu3 %v716_v25 }
 0x13c   :  { %748 = vmatpush.msra.mxu2 %v699_v5  ;;  %768 = vmatpush.msra.mxu3 %v715_v26 }
 0x13e   :  { %749 = vmatpush.msra.mxu2 %v698_v27  ;;  %769 = vmatpush.msra.mxu3 %v714_v28 }
 0x17c   :  { %v245_v31 = vpop.f32.mrf.mxu0  ;;  %v265_v32 = vpop.f32.mrf.mxu1 }
 0x180   :  { %v287_v10 = vpop.f32.mrf.mxu2  ;;  %v307_v3 = vpop.f32.mrf.mxu3 }
 0x181   :  { %v288_v35 = vadd.f32 %v287_v10, %v245_v31  ;;  %v308_v36 = vadd.f32 %v307_v3, %v265_v32 }
 0x184   :  { %v555_v39 = vpop.f32.mrf.mxu0  ;;  %v575_v40 = vpop.f32.mrf.mxu1 }
 0x188   :  { %v339_v18 = vpop.f32.mrf.mxu2  ;;  %v359_v19 = vpop.f32.mrf.mxu3 }
 0x189   :  { %v362_v37 = vadd.f32 %v339_v18, %v288_v35  ;;  %v363_v38 = vadd.f32 %v359_v19, %v308_v36 }
 0x18c   :  { %v663_v58 = vpop.f32.mrf.mxu0  ;;  %v683_v59 = vpop.f32.mrf.mxu1 }
 0x190   :  { %v393_v29 = vpop.f32.mrf.mxu2  ;;  %v413_v30 = vpop.f32.mrf.mxu3 }
 0x191   :  { %v416_v41 = vadd.f32 %v393_v29, %v362_v37  ;;  %v417_v42 = vadd.f32 %v413_v30, %v363_v38 }
 0x198   :  { %v447_v33 = vpop.f32.mrf.mxu2  ;;  %v467_v34 = vpop.f32.mrf.mxu3 }
 0x199   :  { %v470_v45 = vadd.f32 %v447_v33, %v416_v41  ;;  %v471_v46 = vadd.f32 %v467_v34, %v417_v42 }
 0x1a0   :  { %v501_v43 = vpop.f32.mrf.mxu2  ;;  %v521_v44 = vpop.f32.mrf.mxu3 }
 0x1a1   :  { %v524_v47 = vadd.f32 %v501_v43, %v470_v45  ;;  %v525_v48 = vadd.f32 %v521_v44, %v471_v46 }
 0x1a3   :  { %v578_v50 = vadd.f32 %v555_v39, %v524_v47  ;;  %v579_v51 = vadd.f32 %v575_v40, %v525_v48 }
 0x1a8   :  { %v609_v52 = vpop.f32.mrf.mxu2  ;;  %v629_v53 = vpop.f32.mrf.mxu3 }
 0x1a9   :  { %v632_v54 = vadd.f32 %v609_v52, %v578_v50  ;;  %v633_v56 = vadd.f32 %v629_v53, %v579_v51 }
 0x1ab   :  { %v686_v60 = vadd.f32 %v663_v58, %v632_v54  ;;  %v687_v61 = vadd.f32 %v683_v59, %v633_v56 }
 0x1ad   :  { %v694_v62 = vadd.f32 %v690_v55, %v686_v60  ;;  %v695_v63 = vadd.f32 %v691_v57, %v687_v61 }
 0x1af   :  { %v696_v0 = vmax.f32 %v694_v62, 0.0  ;;  %v697_v1 = vmax.f32 %v695_v63, 0.0 }
 0x1b1   :  { %750 = vmatmul.f32.vlgmr.msra.gmra.mxu2 %v696_v0  ;;  %770 = vmatmul.f32.vlgmr.msra.gmra.mxu3 %v697_v1 }
 0x234   :  { %v751_v6 = vpop.f32.mrf.mxu2  ;;  %v771_v8 = vpop.f32.mrf.mxu3 }
 0x235   :  { %v752_v7 = vadd.f32 %v806_v2, %v751_v6 }
 0x237   :  { %v772_v9 = vadd.f32 %v771_v8, %v752_v7 }
 0x239   :  { %811 = vtanh.f32 %v772_v9 }
 0x23f   :  { %v812_v10 = vpop.eup %811 }
 0x240   :  { %776 = vst.msk [vmem:[%s1177_s8] sm:$0x3] %vm775_vm6, %v812_v10 }
 0x241   :  { %781 = vsyncpa [#allocation4], 1 }

</bundles_post_ra>
